<compile_context>
chip_gen: v6e
topology: v6e:2x2x1
jax: 0.10.0
libtpu: 0.0.40
codegen_flags: <defaults>
</compile_context>

<pallas_src>
import numpy as np
import jax
import jax.numpy as jnp
from jax.experimental import pallas as pl
from jax.experimental.pallas import tpu as pltpu


# ----------------------------------------------------------------------------
# Host-side constant builders (numpy, deterministic)
# ----------------------------------------------------------------------------
def _dw_masks(H, W):
    """(9, H*W) {0,1} masks: tap t=(dy+1)*3+(dx+1) valid iff (h+dy, w+dx) is
    inside the image (zero-padding semantics of the depthwise conv)."""
    h = np.arange(H)[:, None]
    w = np.arange(W)[None, :]
    rows = []
    for dy in (-1, 0, 1):
        for dx in (-1, 0, 1):
            valid = (h + dy >= 0) & (h + dy < H) & (w + dx >= 0) & (w + dx < W)
            rows.append(valid.astype(np.float32).reshape(-1))
    return np.stack(rows, axis=0)


def _bilinear_matrix(n_in, n_out):
    """(n_out, n_in) interpolation matrix for align_corners=True bilinear."""
    if n_in == 1:
        return np.ones((n_out, 1), np.float32)
    src = np.arange(n_out, dtype=np.float64) * (n_in - 1) / (n_out - 1)
    i0 = np.minimum(np.floor(src).astype(np.int64), n_in - 2)
    frac = src - i0
    m = np.zeros((n_out, n_in), np.float64)
    m[np.arange(n_out), i0] += 1.0 - frac
    m[np.arange(n_out), i0 + 1] += frac
    return m.astype(np.float32)


def _upsample2x_matrix(H0, W0):
    """Dense (S0, S1) matrix M with  up_flat = y_flat @ M  implementing
    align_corners=True bilinear 2x on a row-major flattened (H, W) axis."""
    A = _bilinear_matrix(H0, 2 * H0)          # (H1, H0)
    B = _bilinear_matrix(W0, 2 * W0)          # (W1, W0)
    # kron(A,B)[a*W1+b, h*W0+w] = A[a,h]*B[b,w]
    return np.kron(A, B).T.astype(np.float32)  # (H0*W0, H1*W1)


# ----------------------------------------------------------------------------
# Kernel
# ----------------------------------------------------------------------------
def _make_kernel(chA, chB, C, W0, W1, S0, S1):
    def split_pw(slab, cin):
        """slab: (C, cin + C + 3) = [w1 | w2 | b1 | bdw | b2] (static slices)."""
        w1 = slab[:, :cin]
        w2 = slab[:, cin:cin + C]
        b1 = slab[:, cin + C:cin + C + 1]
        bdw = slab[:, cin + C + 1:cin + C + 2]
        b2 = slab[:, cin + C + 2:cin + C + 3]
        return w1, w2, b1, bdw, b2

    def pw_relu(w, x, b):
        """Pointwise conv (+ folded BN) + ReLU: (Cout,Cin)@(Cin,S) + (Cout,1)."""
        y = jnp.dot(w, x, preferred_element_type=jnp.float32) + b
        return jnp.maximum(y, 0.0)

    def dw3x3(y, maskw, bdw, W, S):
        """Depthwise 3x3, padding=1 (+ folded BN), no activation.
        y: (C, S); maskw: (9, C, S) = boundary-mask x tap-weight; bdw: (C, 1).
        One zero-padded buffer + static lane slices per tap (no per-tap concat)."""
        pad = W + 1
        z = jnp.zeros((C, pad), jnp.float32)
        ypad = jnp.concatenate([z, y, z], axis=1)        # (C, S + 2*(W+1))
        acc = y * maskw[4] + bdw                         # centre tap (mask==1)
        for dy in (-1, 0, 1):
            for dx in (-1, 0, 1):
                if dy == 0 and dx == 0:
                    continue
                t = (dy + 1) * 3 + (dx + 1)
                s = dy * W + dx
                acc = acc + ypad[:, pad + s: pad + s + S] * maskw[t]
        return acc

    def branch(x, slab, maskw, cin, W, S):
        w1, w2, b1, bdw, b2 = split_pw(slab, cin)
        y = pw_relu(w1, x, b1)
        y = dw3x3(y, maskw, bdw, W, S)
        return pw_relu(w2, y, b2)

    def kernel(x0_ref, x1_ref, pwu_ref, mwu_ref, pws_ref, mws_ref,
               upmat_ref, o_ref):
        # Upsample branch: (chA, S0) -> (C, S0) -> bilinear 2x -> (C, S1),
        # where the 2x upsample is a single (C, S0) @ (S0, S1) MXU matmul.
        yu = branch(x0_ref[...], pwu_ref[...], mwu_ref[...], chA, W0, S0)
        up = jnp.dot(yu, upmat_ref[...], preferred_element_type=jnp.float32)

        # Shallow branch: (chB, S1) -> (C, S1).
        ys = branch(x1_ref[...], pws_ref[...], mws_ref[...], chB, W1, S1)

        # Output block is a full (2C, S1) = (8, 256) tile: contiguous writeback.
        o_ref[pl.ds(0, C), :] = up.astype(o_ref.dtype)
        o_ref[pl.ds(C, C), :] = ys.astype(o_ref.dtype)

    return kernel


# ----------------------------------------------------------------------------
# Public wrapper
# ----------------------------------------------------------------------------
def multi_feat_fusion2(x0, x1, up_params, sh_params, *, interpret=False):
    """Forward of MultiFeatFusionModule2 (inference, BN folded).

    x0: (N, chA, H0, W0) NCHW, x1: (N, chB, 2*H0, 2*W0) NCHW.
    *_params: dict of folded conv+BN params:
        w1 (C, Cin), b1 (C, 1), wdw (9, C, 1), bdw (C, 1), w2 (C, C), b2 (C, 1)
    Returns (N, 2*C, 2*H0, 2*W0) NCHW (= torch.cat([upsample, shallow], dim=1)).
    """
    N, chA, H0, W0 = x0.shape
    N1, chB, H1, W1 = x1.shape
    assert N1 == N and H1 == 2 * H0 and W1 == 2 * W0
    C = up_params["w1"].shape[0]
    S0, S1 = H0 * W0, H1 * W1

    # Free metadata reshapes (NCHW is contiguous over H, W) -- no transposes.
    x0f = x0.reshape(N, chA, S0)
    x1f = x1.reshape(N, chB, S1)

    def pack_branch(p, HH, WW):
        mask = jnp.asarray(_dw_masks(HH, WW))            # (9, S)
        maskw = mask[:, None, :] * p["wdw"]              # (9, C, S): mask x tap-w
        slab = jnp.concatenate(                          # (C, cin + C + 3)
            [p["w1"], p["w2"], p["b1"], p["bdw"], p["b2"]], axis=1)
        return slab, maskw

    pwu, mwu = pack_branch(up_params, H0, W0)
    pws, mws = pack_branch(sh_params, H1, W1)
    upmat = jnp.asarray(_upsample2x_matrix(H0, W0))      # (S0, S1), 64 KB here

    kernel = _make_kernel(chA, chB, C, W0, W1, S0, S1)

    def cspec(arr):      # grid-invariant operand: constant index_map, resident
        nd = arr.ndim
        return pl.BlockSpec(arr.shape, lambda b, _nd=nd: (0,) * _nd)

    out = pl.pallas_call(
        kernel,
        out_shape=jax.ShapeDtypeStruct((N, 2 * C, S1), jnp.float32),
        grid=(N,),
        in_specs=[
            pl.BlockSpec((None, chA, S0), lambda b: (b, 0, 0)),   # x0 (batch squeezed)
            pl.BlockSpec((None, chB, S1), lambda b: (b, 0, 0)),   # x1 (batch squeezed)
            cspec(pwu), cspec(mwu),                               # upsample-branch params
            cspec(pws), cspec(mws),                               # shallow-branch params
            cspec(upmat),                                         # dense 2x bilinear matrix
        ],
        out_specs=pl.BlockSpec((None, 2 * C, S1), lambda b: (b, 0, 0)),
        compiler_params=pltpu.CompilerParams(
            dimension_semantics=("parallel",),
            vmem_limit_bytes=4 * 1024 * 1024,   # real footprint ~0.5 MiB
        ),
        interpret=interpret,
    )(x0f, x1f, pwu, mwu, pws, mws, upmat)

    # Free reshape: (N, 2C, S1) -> (N, 2C, H1, W1)  == channel concat order.
    return out.reshape(N, 2 * C, H1, W1)


# ----------------------------------------------------------------------------
# Parameter construction (deterministic, synthetic) + BN folding (glue)
# ----------------------------------------------------------------------------
def _convnormact_params(key, cin, cout, k, depthwise=False):
    kw, kg, kb, km, kv = jax.random.split(key, 5)
    shape = (cout, 1, k, k) if depthwise else (cout, cin, k, k)
    w = 0.2 * jax.random.normal(kw, shape, jnp.float32)
    gamma = 1.0 + 0.1 * jax.random.normal(kg, (cout,), jnp.float32)
    beta = 0.1 * jax.random.normal(kb, (cout,), jnp.float32)
    mean = 0.1 * jax.random.normal(km, (cout,), jnp.float32)
    var = jax.random.uniform(kv, (cout,), jnp.float32, minval=0.5, maxval=1.5)
    return w, gamma, beta, mean, var


def _fold_bn(w, gamma, beta, mean, var, eps=1e-5):
    scale = gamma / jnp.sqrt(var + eps)
    return w * scale[:, None, None, None], beta - mean * scale


def _fold_pointwise(p):
    wf, bf = _fold_bn(*p)                      # (Cout, Cin, 1, 1)
    return wf[:, :, 0, 0], bf[:, None]         # (Cout, Cin), (Cout, 1)


def _fold_depthwise(p):
    wf, bf = _fold_bn(*p)                      # (C, 1, 3, 3)
    c = wf.shape[0]
    wt = jnp.transpose(wf[:, 0].reshape(c, 9), (1, 0))[:, :, None]  # (9, C, 1)
    return wt, bf[:, None]                     # tap t = ky*3 + kx


def _make_branch_params(key, cin, cout):
    k1, k2, k3 = jax.random.split(key, 3)
    w1, b1 = _fold_pointwise(_convnormact_params(k1, cin, cout, 1))
    wdw, bdw = _fold_depthwise(_convnormact_params(k2, cout, cout, 3, True))
    w2, b2 = _fold_pointwise(_convnormact_params(k3, cout, cout, 1))
    return dict(w1=w1, b1=b1, wdw=wdw, bdw=bdw, w2=w2, b2=b2)


# ----------------------------------------------------------------------------
# Pure-JAX reference (same folded params) for correctness check
# ----------------------------------------------------------------------------
def _ref_conv_stack(x, p):
    N, Cin, H, W = x.shape
    y = jnp.maximum(
        jnp.einsum('oc,nchw->nohw', p["w1"], x) + p["b1"].reshape(1, -1, 1, 1), 0.0)
    yp = jnp.pad(y, ((0, 0), (0, 0), (1, 1), (1, 1)))
    acc = jnp.zeros_like(y)
    for t in range(9):
        ky, kx = t // 3, t % 3
        acc = acc + yp[:, :, ky:ky + H, kx:kx + W] * p["wdw"][t, :, 0].reshape(1, -1, 1, 1)
    y = acc + p["bdw"].reshape(1, -1, 1, 1)
    return jnp.maximum(
        jnp.einsum('oc,nchw->nohw', p["w2"], y) + p["b2"].reshape(1, -1, 1, 1), 0.0)


def _ref_upsample2x(y):
    _, _, H, W = y.shape
    am = jnp.asarray(_bilinear_matrix(H, 2 * H))
    bm = jnp.asarray(_bilinear_matrix(W, 2 * W))
    y = jnp.einsum('ah,nchw->ncaw', am, y)
    return jnp.einsum('bw,ncaw->ncab', bm, y)


def _ref_forward(x0, x1, up_p, sh_p):
    up = _ref_upsample2x(_ref_conv_stack(x0, up_p))
    sh = _ref_conv_stack(x1, sh_p)
    return jnp.concatenate([up, sh], axis=1)


# ----------------------------------------------------------------------------
if __name__ == "__main__":
    key = jax.random.PRNGKey(0)
    kx0, kx1, ku, ks = jax.random.split(key, 4)

    # Small shapes consistent with the module: x0 is half-resolution of x1.
    chA, chB = 8, 8
    outch = 32 if chA in (96, 64, 116) else chB // 2     # -> 4
    N, H1, W1 = 2, 16, 16
    H0, W0 = H1 // 2, W1 // 2

    x0 = jax.random.normal(kx0, (N, chA, H0, W0), jnp.float32)   # NCHW
    x1 = jax.random.normal(kx1, (N, chB, H1, W1), jnp.float32)   # NCHW

    up_params = _make_branch_params(ku, chA, outch)
    sh_params = _make_branch_params(ks, chB, outch)

    out = multi_feat_fusion2(x0, x1, up_params, sh_params)
    out = jax.block_until_ready(out)

    ref = _ref_forward(x0, x1, up_params, sh_params)

    assert out.shape == (N, 2 * outch, H1, W1), out.shape
    err = float(jnp.max(jnp.abs(out - ref)))
    assert err < 1e-3, err
    print("KERNEL_OK")
</pallas_src>

<mosaic_0001>
module attributes {stable_mosaic.version = 11 : i64} {
  func.func @kernel(%arg0: i32, %arg1: memref<1x8x64xf32, #tpu.memory_space<vmem>>, %arg2: memref<1x8x256xf32, #tpu.memory_space<vmem>>, %arg3: memref<4x15xf32, #tpu.memory_space<vmem>>, %arg4: memref<9x4x64xf32, #tpu.memory_space<vmem>>, %arg5: memref<4x15xf32, #tpu.memory_space<vmem>>, %arg6: memref<9x4x256xf32, #tpu.memory_space<vmem>>, %arg7: memref<64x256xf32, #tpu.memory_space<vmem>>, %arg8: memref<1x8x256xf32, #tpu.memory_space<vmem>>) attributes {dimension_semantics = [#tpu.dimension_semantics<parallel>], iteration_bounds = array<i64: 2>, scalar_prefetch = 0 : i64, scratch_operands = 0 : i64, tpu.core_type = #tpu.core_type<tc>, window_params = [{transform_indices = @transform_0, window_bounds = array<i64: 1, 8, 64>}, {transform_indices = @transform_1, window_bounds = array<i64: 1, 8, 256>}, {pipeline_mode = #tpu.pipeline_mode<synchronous>, transform_indices = @transform_2, window_bounds = array<i64: 4, 15>}, {pipeline_mode = #tpu.pipeline_mode<synchronous>, transform_indices = @transform_3, window_bounds = array<i64: 9, 4, 64>}, {pipeline_mode = #tpu.pipeline_mode<synchronous>, transform_indices = @transform_4, window_bounds = array<i64: 4, 15>}, {pipeline_mode = #tpu.pipeline_mode<synchronous>, transform_indices = @transform_5, window_bounds = array<i64: 9, 4, 256>}, {pipeline_mode = #tpu.pipeline_mode<synchronous>, transform_indices = @transform_6, window_bounds = array<i64: 64, 256>}, {transform_indices = @transform_7, window_bounds = array<i64: 1, 8, 256>}]} {
    %c0 = arith.constant 0 : index
    %c0_0 = arith.constant 0 : index
    %c0_1 = arith.constant 0 : index
    %0 = vector.load %arg1[%c0, %c0_0, %c0_1] : memref<1x8x64xf32, #tpu.memory_space<vmem>>, vector<1x8x64xf32>
    %1 = vector.shape_cast %0 : vector<1x8x64xf32> to vector<8x64xf32>
    %c0_2 = arith.constant 0 : index
    %c0_3 = arith.constant 0 : index
    %2 = vector.load %arg3[%c0_2, %c0_3] : memref<4x15xf32, #tpu.memory_space<vmem>>, vector<4x15xf32>
    %c0_4 = arith.constant 0 : index
    %c0_5 = arith.constant 0 : index
    %c0_6 = arith.constant 0 : index
    %3 = vector.load %arg4[%c0_4, %c0_5, %c0_6] : memref<9x4x64xf32, #tpu.memory_space<vmem>>, vector<9x4x64xf32>
    %4 = vector.extract_strided_slice %2 {offsets = [0, 0], sizes = [4, 8], strides = [1, 1]} : vector<4x15xf32> to vector<4x8xf32>
    %5 = vector.extract_strided_slice %2 {offsets = [0, 8], sizes = [4, 4], strides = [1, 1]} : vector<4x15xf32> to vector<4x4xf32>
    %6 = vector.extract_strided_slice %2 {offsets = [0, 12], sizes = [4, 1], strides = [1, 1]} : vector<4x15xf32> to vector<4x1xf32>
    %7 = vector.extract_strided_slice %2 {offsets = [0, 13], sizes = [4, 1], strides = [1, 1]} : vector<4x15xf32> to vector<4x1xf32>
    %8 = vector.extract_strided_slice %2 {offsets = [0, 14], sizes = [4, 1], strides = [1, 1]} : vector<4x15xf32> to vector<4x1xf32>
    %cst = arith.constant dense<0.000000e+00> : vector<4x64xf32>
    %9 = tpu.matmul %4, %1, %cst {dimension_numbers = #tpu.dot_dimension_numbers<[1], [0], [0], [1], [0, 0, 1, 1], [], []>} : vector<4x8xf32>, vector<8x64xf32>, vector<4x64xf32> -> vector<4x64xf32>
    %10 = vector.broadcast %6 : vector<4x1xf32> to vector<4x64xf32>
    %11 = arith.addf %9, %10 : vector<4x64xf32>
    %cst_7 = arith.constant 0.000000e+00 : f32
    %12 = vector.broadcast %cst_7 : f32 to vector<4x64xf32>
    %13 = arith.maximumf %11, %12 : vector<4x64xf32>
    %cst_8 = arith.constant 0.000000e+00 : f32
    %14 = vector.broadcast %cst_8 : f32 to vector<4x9xf32>
    %15 = tpu.concatenate %14, %13, %14 in 1 : vector<4x9xf32>, vector<4x64xf32>, vector<4x9xf32> -> vector<4x82xf32>
    %16 = vector.extract_strided_slice %3 {offsets = [4, 0, 0], sizes = [1, 4, 64], strides = [1, 1, 1]} : vector<9x4x64xf32> to vector<1x4x64xf32>
    %17 = vector.shape_cast %16 : vector<1x4x64xf32> to vector<4x64xf32>
    %18 = arith.mulf %13, %17 : vector<4x64xf32>
    %19 = vector.broadcast %7 : vector<4x1xf32> to vector<4x64xf32>
    %20 = arith.addf %18, %19 : vector<4x64xf32>
    %21 = vector.extract_strided_slice %15 {offsets = [0, 0], sizes = [4, 64], strides = [1, 1]} : vector<4x82xf32> to vector<4x64xf32>
    %22 = vector.extract_strided_slice %3 {offsets = [0, 0, 0], sizes = [1, 4, 64], strides = [1, 1, 1]} : vector<9x4x64xf32> to vector<1x4x64xf32>
    %23 = vector.shape_cast %22 : vector<1x4x64xf32> to vector<4x64xf32>
    %24 = arith.mulf %21, %23 : vector<4x64xf32>
    %25 = arith.addf %20, %24 : vector<4x64xf32>
    %26 = vector.extract_strided_slice %15 {offsets = [0, 1], sizes = [4, 64], strides = [1, 1]} : vector<4x82xf32> to vector<4x64xf32>
    %27 = vector.extract_strided_slice %3 {offsets = [1, 0, 0], sizes = [1, 4, 64], strides = [1, 1, 1]} : vector<9x4x64xf32> to vector<1x4x64xf32>
    %28 = vector.shape_cast %27 : vector<1x4x64xf32> to vector<4x64xf32>
    %29 = arith.mulf %26, %28 : vector<4x64xf32>
    %30 = arith.addf %25, %29 : vector<4x64xf32>
    %31 = vector.extract_strided_slice %15 {offsets = [0, 2], sizes = [4, 64], strides = [1, 1]} : vector<4x82xf32> to vector<4x64xf32>
    %32 = vector.extract_strided_slice %3 {offsets = [2, 0, 0], sizes = [1, 4, 64], strides = [1, 1, 1]} : vector<9x4x64xf32> to vector<1x4x64xf32>
    %33 = vector.shape_cast %32 : vector<1x4x64xf32> to vector<4x64xf32>
    %34 = arith.mulf %31, %33 : vector<4x64xf32>
    %35 = arith.addf %30, %34 : vector<4x64xf32>
    %36 = vector.extract_strided_slice %15 {offsets = [0, 8], sizes = [4, 64], strides = [1, 1]} : vector<4x82xf32> to vector<4x64xf32>
    %37 = vector.extract_strided_slice %3 {offsets = [3, 0, 0], sizes = [1, 4, 64], strides = [1, 1, 1]} : vector<9x4x64xf32> to vector<1x4x64xf32>
    %38 = vector.shape_cast %37 : vector<1x4x64xf32> to vector<4x64xf32>
    %39 = arith.mulf %36, %38 : vector<4x64xf32>
    %40 = arith.addf %35, %39 : vector<4x64xf32>
    %41 = vector.extract_strided_slice %15 {offsets = [0, 10], sizes = [4, 64], strides = [1, 1]} : vector<4x82xf32> to vector<4x64xf32>
    %42 = vector.extract_strided_slice %3 {offsets = [5, 0, 0], sizes = [1, 4, 64], strides = [1, 1, 1]} : vector<9x4x64xf32> to vector<1x4x64xf32>
    %43 = vector.shape_cast %42 : vector<1x4x64xf32> to vector<4x64xf32>
    %44 = arith.mulf %41, %43 : vector<4x64xf32>
    %45 = arith.addf %40, %44 : vector<4x64xf32>
    %46 = vector.extract_strided_slice %15 {offsets = [0, 16], sizes = [4, 64], strides = [1, 1]} : vector<4x82xf32> to vector<4x64xf32>
    %47 = vector.extract_strided_slice %3 {offsets = [6, 0, 0], sizes = [1, 4, 64], strides = [1, 1, 1]} : vector<9x4x64xf32> to vector<1x4x64xf32>
    %48 = vector.shape_cast %47 : vector<1x4x64xf32> to vector<4x64xf32>
    %49 = arith.mulf %46, %48 : vector<4x64xf32>
    %50 = arith.addf %45, %49 : vector<4x64xf32>
    %51 = vector.extract_strided_slice %15 {offsets = [0, 17], sizes = [4, 64], strides = [1, 1]} : vector<4x82xf32> to vector<4x64xf32>
    %52 = vector.extract_strided_slice %3 {offsets = [7, 0, 0], sizes = [1, 4, 64], strides = [1, 1, 1]} : vector<9x4x64xf32> to vector<1x4x64xf32>
    %53 = vector.shape_cast %52 : vector<1x4x64xf32> to vector<4x64xf32>
    %54 = arith.mulf %51, %53 : vector<4x64xf32>
    %55 = arith.addf %50, %54 : vector<4x64xf32>
    %56 = vector.extract_strided_slice %15 {offsets = [0, 18], sizes = [4, 64], strides = [1, 1]} : vector<4x82xf32> to vector<4x64xf32>
    %57 = vector.extract_strided_slice %3 {offsets = [8, 0, 0], sizes = [1, 4, 64], strides = [1, 1, 1]} : vector<9x4x64xf32> to vector<1x4x64xf32>
    %58 = vector.shape_cast %57 : vector<1x4x64xf32> to vector<4x64xf32>
    %59 = arith.mulf %56, %58 : vector<4x64xf32>
    %60 = arith.addf %55, %59 : vector<4x64xf32>
    %cst_9 = arith.constant dense<0.000000e+00> : vector<4x64xf32>
    %61 = tpu.matmul %5, %60, %cst_9 {dimension_numbers = #tpu.dot_dimension_numbers<[1], [0], [0], [1], [0, 0, 1, 1], [], []>} : vector<4x4xf32>, vector<4x64xf32>, vector<4x64xf32> -> vector<4x64xf32>
    %62 = vector.broadcast %8 : vector<4x1xf32> to vector<4x64xf32>
    %63 = arith.addf %61, %62 : vector<4x64xf32>
    %cst_10 = arith.constant 0.000000e+00 : f32
    %64 = vector.broadcast %cst_10 : f32 to vector<4x64xf32>
    %65 = arith.maximumf %63, %64 : vector<4x64xf32>
    %c0_11 = arith.constant 0 : index
    %c0_12 = arith.constant 0 : index
    %66 = vector.load %arg7[%c0_11, %c0_12] : memref<64x256xf32, #tpu.memory_space<vmem>>, vector<64x256xf32>
    %cst_13 = arith.constant dense<0.000000e+00> : vector<4x256xf32>
    %67 = tpu.matmul %65, %66, %cst_13 {dimension_numbers = #tpu.dot_dimension_numbers<[1], [0], [0], [1], [0, 0, 1, 1], [], []>} : vector<4x64xf32>, vector<64x256xf32>, vector<4x256xf32> -> vector<4x256xf32>
    %c0_14 = arith.constant 0 : index
    %c0_15 = arith.constant 0 : index
    %c0_16 = arith.constant 0 : index
    %68 = vector.load %arg2[%c0_14, %c0_15, %c0_16] : memref<1x8x256xf32, #tpu.memory_space<vmem>>, vector<1x8x256xf32>
    %69 = vector.shape_cast %68 : vector<1x8x256xf32> to vector<8x256xf32>
    %c0_17 = arith.constant 0 : index
    %c0_18 = arith.constant 0 : index
    %70 = vector.load %arg5[%c0_17, %c0_18] : memref<4x15xf32, #tpu.memory_space<vmem>>, vector<4x15xf32>
    %c0_19 = arith.constant 0 : index
    %c0_20 = arith.constant 0 : index
    %c0_21 = arith.constant 0 : index
    %71 = vector.load %arg6[%c0_19, %c0_20, %c0_21] : memref<9x4x256xf32, #tpu.memory_space<vmem>>, vector<9x4x256xf32>
    %72 = vector.extract_strided_slice %70 {offsets = [0, 0], sizes = [4, 8], strides = [1, 1]} : vector<4x15xf32> to vector<4x8xf32>
    %73 = vector.extract_strided_slice %70 {offsets = [0, 8], sizes = [4, 4], strides = [1, 1]} : vector<4x15xf32> to vector<4x4xf32>
    %74 = vector.extract_strided_slice %70 {offsets = [0, 12], sizes = [4, 1], strides = [1, 1]} : vector<4x15xf32> to vector<4x1xf32>
    %75 = vector.extract_strided_slice %70 {offsets = [0, 13], sizes = [4, 1], strides = [1, 1]} : vector<4x15xf32> to vector<4x1xf32>
    %76 = vector.extract_strided_slice %70 {offsets = [0, 14], sizes = [4, 1], strides = [1, 1]} : vector<4x15xf32> to vector<4x1xf32>
    %cst_22 = arith.constant dense<0.000000e+00> : vector<4x256xf32>
    %77 = tpu.matmul %72, %69, %cst_22 {dimension_numbers = #tpu.dot_dimension_numbers<[1], [0], [0], [1], [0, 0, 1, 1], [], []>} : vector<4x8xf32>, vector<8x256xf32>, vector<4x256xf32> -> vector<4x256xf32>
    %78 = vector.broadcast %74 : vector<4x1xf32> to vector<4x256xf32>
    %79 = arith.addf %77, %78 : vector<4x256xf32>
    %cst_23 = arith.constant 0.000000e+00 : f32
    %80 = vector.broadcast %cst_23 : f32 to vector<4x256xf32>
    %81 = arith.maximumf %79, %80 : vector<4x256xf32>
    %cst_24 = arith.constant 0.000000e+00 : f32
    %82 = vector.broadcast %cst_24 : f32 to vector<4x17xf32>
    %83 = tpu.concatenate %82, %81, %82 in 1 : vector<4x17xf32>, vector<4x256xf32>, vector<4x17xf32> -> vector<4x290xf32>
    %84 = vector.extract_strided_slice %71 {offsets = [4, 0, 0], sizes = [1, 4, 256], strides = [1, 1, 1]} : vector<9x4x256xf32> to vector<1x4x256xf32>
    %85 = vector.shape_cast %84 : vector<1x4x256xf32> to vector<4x256xf32>
    %86 = arith.mulf %81, %85 : vector<4x256xf32>
    %87 = vector.broadcast %75 : vector<4x1xf32> to vector<4x256xf32>
    %88 = arith.addf %86, %87 : vector<4x256xf32>
    %89 = vector.extract_strided_slice %83 {offsets = [0, 0], sizes = [4, 256], strides = [1, 1]} : vector<4x290xf32> to vector<4x256xf32>
    %90 = vector.extract_strided_slice %71 {offsets = [0, 0, 0], sizes = [1, 4, 256], strides = [1, 1, 1]} : vector<9x4x256xf32> to vector<1x4x256xf32>
    %91 = vector.shape_cast %90 : vector<1x4x256xf32> to vector<4x256xf32>
    %92 = arith.mulf %89, %91 : vector<4x256xf32>
    %93 = arith.addf %88, %92 : vector<4x256xf32>
    %94 = vector.extract_strided_slice %83 {offsets = [0, 1], sizes = [4, 256], strides = [1, 1]} : vector<4x290xf32> to vector<4x256xf32>
    %95 = vector.extract_strided_slice %71 {offsets = [1, 0, 0], sizes = [1, 4, 256], strides = [1, 1, 1]} : vector<9x4x256xf32> to vector<1x4x256xf32>
    %96 = vector.shape_cast %95 : vector<1x4x256xf32> to vector<4x256xf32>
    %97 = arith.mulf %94, %96 : vector<4x256xf32>
    %98 = arith.addf %93, %97 : vector<4x256xf32>
    %99 = vector.extract_strided_slice %83 {offsets = [0, 2], sizes = [4, 256], strides = [1, 1]} : vector<4x290xf32> to vector<4x256xf32>
    %100 = vector.extract_strided_slice %71 {offsets = [2, 0, 0], sizes = [1, 4, 256], strides = [1, 1, 1]} : vector<9x4x256xf32> to vector<1x4x256xf32>
    %101 = vector.shape_cast %100 : vector<1x4x256xf32> to vector<4x256xf32>
    %102 = arith.mulf %99, %101 : vector<4x256xf32>
    %103 = arith.addf %98, %102 : vector<4x256xf32>
    %104 = vector.extract_strided_slice %83 {offsets = [0, 16], sizes = [4, 256], strides = [1, 1]} : vector<4x290xf32> to vector<4x256xf32>
    %105 = vector.extract_strided_slice %71 {offsets = [3, 0, 0], sizes = [1, 4, 256], strides = [1, 1, 1]} : vector<9x4x256xf32> to vector<1x4x256xf32>
    %106 = vector.shape_cast %105 : vector<1x4x256xf32> to vector<4x256xf32>
    %107 = arith.mulf %104, %106 : vector<4x256xf32>
    %108 = arith.addf %103, %107 : vector<4x256xf32>
    %109 = vector.extract_strided_slice %83 {offsets = [0, 18], sizes = [4, 256], strides = [1, 1]} : vector<4x290xf32> to vector<4x256xf32>
    %110 = vector.extract_strided_slice %71 {offsets = [5, 0, 0], sizes = [1, 4, 256], strides = [1, 1, 1]} : vector<9x4x256xf32> to vector<1x4x256xf32>
    %111 = vector.shape_cast %110 : vector<1x4x256xf32> to vector<4x256xf32>
    %112 = arith.mulf %109, %111 : vector<4x256xf32>
    %113 = arith.addf %108, %112 : vector<4x256xf32>
    %114 = vector.extract_strided_slice %83 {offsets = [0, 32], sizes = [4, 256], strides = [1, 1]} : vector<4x290xf32> to vector<4x256xf32>
    %115 = vector.extract_strided_slice %71 {offsets = [6, 0, 0], sizes = [1, 4, 256], strides = [1, 1, 1]} : vector<9x4x256xf32> to vector<1x4x256xf32>
    %116 = vector.shape_cast %115 : vector<1x4x256xf32> to vector<4x256xf32>
    %117 = arith.mulf %114, %116 : vector<4x256xf32>
    %118 = arith.addf %113, %117 : vector<4x256xf32>
    %119 = vector.extract_strided_slice %83 {offsets = [0, 33], sizes = [4, 256], strides = [1, 1]} : vector<4x290xf32> to vector<4x256xf32>
    %120 = vector.extract_strided_slice %71 {offsets = [7, 0, 0], sizes = [1, 4, 256], strides = [1, 1, 1]} : vector<9x4x256xf32> to vector<1x4x256xf32>
    %121 = vector.shape_cast %120 : vector<1x4x256xf32> to vector<4x256xf32>
    %122 = arith.mulf %119, %121 : vector<4x256xf32>
    %123 = arith.addf %118, %122 : vector<4x256xf32>
    %124 = vector.extract_strided_slice %83 {offsets = [0, 34], sizes = [4, 256], strides = [1, 1]} : vector<4x290xf32> to vector<4x256xf32>
    %125 = vector.extract_strided_slice %71 {offsets = [8, 0, 0], sizes = [1, 4, 256], strides = [1, 1, 1]} : vector<9x4x256xf32> to vector<1x4x256xf32>
    %126 = vector.shape_cast %125 : vector<1x4x256xf32> to vector<4x256xf32>
    %127 = arith.mulf %124, %126 : vector<4x256xf32>
    %128 = arith.addf %123, %127 : vector<4x256xf32>
    %cst_25 = arith.constant dense<0.000000e+00> : vector<4x256xf32>
    %129 = tpu.matmul %73, %128, %cst_25 {dimension_numbers = #tpu.dot_dimension_numbers<[1], [0], [0], [1], [0, 0, 1, 1], [], []>} : vector<4x4xf32>, vector<4x256xf32>, vector<4x256xf32> -> vector<4x256xf32>
    %130 = vector.broadcast %76 : vector<4x1xf32> to vector<4x256xf32>
    %131 = arith.addf %129, %130 : vector<4x256xf32>
    %cst_26 = arith.constant 0.000000e+00 : f32
    %132 = vector.broadcast %cst_26 : f32 to vector<4x256xf32>
    %133 = arith.maximumf %131, %132 : vector<4x256xf32>
    %c0_27 = arith.constant 0 : index
    %c0_28 = arith.constant 0 : index
    %c0_29 = arith.constant 0 : index
    %134 = vector.load %arg8[%c0_27, %c0_28, %c0_29] : memref<1x8x256xf32, #tpu.memory_space<vmem>>, vector<1x4x256xf32>
    %135 = vector.shape_cast %134 : vector<1x4x256xf32> to vector<4x256xf32>
    %136 = vector.shape_cast %67 : vector<4x256xf32> to vector<1x4x256xf32>
    tpu.vector_store %arg8[%c0_27, %c0_28, %c0_29], %136 {strides = array<i32>} : memref<1x8x256xf32, #tpu.memory_space<vmem>>, vector<1x4x256xf32>,
    %c0_30 = arith.constant 0 : index
    %c4 = arith.constant 4 : index
    %c0_31 = arith.constant 0 : index
    %137 = vector.load %arg8[%c0_30, %c4, %c0_31] : memref<1x8x256xf32, #tpu.memory_space<vmem>>, vector<1x4x256xf32>
    %138 = vector.shape_cast %137 : vector<1x4x256xf32> to vector<4x256xf32>
    %139 = vector.shape_cast %133 : vector<4x256xf32> to vector<1x4x256xf32>
    tpu.vector_store %arg8[%c0_30, %c4, %c0_31], %139 {strides = array<i32>} : memref<1x8x256xf32, #tpu.memory_space<vmem>>, vector<1x4x256xf32>,
    return
  }
  func.func @transform_0(%arg0: i32) -> (i32, i32, i32) {
    %c0_i32 = arith.constant 0 : i32
    %c0_i32_0 = arith.constant 0 : i32
    %c0_i32_1 = arith.constant 0 : i32
    return %arg0, %c0_i32, %c0_i32_0 : i32, i32, i32
  }
  func.func @transform_1(%arg0: i32) -> (i32, i32, i32) {
    %c0_i32 = arith.constant 0 : i32
    %c0_i32_0 = arith.constant 0 : i32
    %c0_i32_1 = arith.constant 0 : i32
    return %arg0, %c0_i32, %c0_i32_0 : i32, i32, i32
  }
  func.func @transform_2(%arg0: i32) -> (i32, i32) {
    %c0_i32 = arith.constant 0 : i32
    %c0_i32_0 = arith.constant 0 : i32
    %c0_i32_1 = arith.constant 0 : i32
    return %c0_i32, %c0_i32_0 : i32, i32
  }
  func.func @transform_3(%arg0: i32) -> (i32, i32, i32) {
    %c0_i32 = arith.constant 0 : i32
    %c0_i32_0 = arith.constant 0 : i32
    %c0_i32_1 = arith.constant 0 : i32
    %c0_i32_2 = arith.constant 0 : i32
    return %c0_i32, %c0_i32_0, %c0_i32_1 : i32, i32, i32
  }
  func.func @transform_4(%arg0: i32) -> (i32, i32) {
    %c0_i32 = arith.constant 0 : i32
    %c0_i32_0 = arith.constant 0 : i32
    %c0_i32_1 = arith.constant 0 : i32
    return %c0_i32, %c0_i32_0 : i32, i32
  }
  func.func @transform_5(%arg0: i32) -> (i32, i32, i32) {
    %c0_i32 = arith.constant 0 : i32
    %c0_i32_0 = arith.constant 0 : i32
    %c0_i32_1 = arith.constant 0 : i32
    %c0_i32_2 = arith.constant 0 : i32
    return %c0_i32, %c0_i32_0, %c0_i32_1 : i32, i32, i32
  }
  func.func @transform_6(%arg0: i32) -> (i32, i32) {
    %c0_i32 = arith.constant 0 : i32
    %c0_i32_0 = arith.constant 0 : i32
    %c0_i32_1 = arith.constant 0 : i32
    return %c0_i32, %c0_i32_0 : i32, i32
  }
  func.func @transform_7(%arg0: i32) -> (i32, i32, i32) {
    %c0_i32 = arith.constant 0 : i32
    %c0_i32_0 = arith.constant 0 : i32
    %c0_i32_1 = arith.constant 0 : i32
    return %arg0, %c0_i32, %c0_i32_0 : i32, i32, i32
  }
}

</mosaic_0001>

<bundles_post_ra>
// kernel: tpu_custom_call.1
= control target key start
LH: loop header
LB: loop body
LE: loop exit
PB: predicated region body
PF: predicated region fallthrough
CT: control target
= control target key end

     0   :  { %s2235_s0 = inlined_call_operand.hbm [shape: f32[2,8,64], index: 0, kind: input, shape index: {}]   ;;  %s2236_s1 = inlined_call_operand.hbm [shape: f32[2,8,256], index: 1, kind: input, shape index: {}]   ;;  %s2237_s2 = inlined_call_operand.hbm [shape: f32[4,15], index: 2, kind: input, shape index: {}]   ;;  %s2238_s3 = inlined_call_operand.hbm [shape: f32[9,4,64], index: 3, kind: input, shape index: {}]   ;;  %s2239_s4 = inlined_call_operand.vmem [shape: f32[4,15], index: 4, kind: input, shape index: {}]   ;;  %s2240_s5 = inlined_call_operand.hbm [shape: f32[9,4,256], index: 5, kind: input, shape index: {}]   ;;  %s2241_s6 = inlined_call_operand.hbm [shape: f32[64,256], index: 6, kind: input, shape index: {}]   ;;  %s2242_s7 = inlined_call_operand.hbm [shape: f32[2,8,256], index: 7, kind: output, shape index: {}]  }
   0x1   :  { %2247 = sst [smem:[#allocation20_spill]] %s2235_s0 }
   0x2   :  { %2248 = sst [smem:[#allocation21_spill]] %s2237_s2 }
   0x3   :  { %2249 = sst [smem:[#allocation22_spill]] %s2238_s3 }
   0x4   :  { %12 = vsyncpa [#allocation3], 0 }
   0x5   :  { %14 = vsyncpa [#allocation3 + $0x1], 0 }
   0x6   :  { %15 = vsyncpa [#allocation6], 0 }
   0x7   :  { %17 = vsyncpa [#allocation6 + $0x1], 0 }
   0x8   :  { %18 = vsyncpa [#allocation9], 0 }
   0x9   :  { %19 = vsyncpa [#allocation12], 0 }
   0xa   :  { %20 = vsyncpa [#allocation4], 0 }
   0xb   :  { %22 = vsyncpa [#allocation4 + $0x1], 0  ;;  %s1822_s24 = smov 0   ;;  %s1824_s25 = smov 0  }
   0xc   :  { %s1826_s26 = smov 0   ;;  %s1828_s27 = smov 0  }
   0xd LB: > { %s1743_s28 = smov [#allocation7]   ;;  %s1843_s30 = sadd.s32 4294967295, %s1741_s27   ;;  %s1741_s27 = sphi %s1828_s27, %s2276_s27   ;;  %s1737_s26 = sphi %s1826_s26, %s2275_s26   ;;  %s1733_s25 = sphi %s1824_s25, %s2274_s25   ;;  %s1729_s24 = sphi %s1822_s24, %s2273_s24  }
   0xe   : > { %s229_s29 = sshll.u32 %s1743_s28, 4  ;;  %p1316_p0 = scmp.ge.s32.totalorder %s1741_s27, 1  ;;  %s230_s29 = int_to_ptr.vmem [resolvable:$true] %s229_s29 }
   0xf   : > { %p2243_p1 = scmp.eq.s32.totalorder %s1843_s30, 0  ;;  %p216_p2 = scmp.lt.s32.totalorder %s1741_s27, 3 }
  0x10   : > { %s1744_s9 = smov [#allocation8]   ;;  %s1745_s12 = smov [#allocation10]  }
  0x11   : > { %p1848_p3 = pnand %p1316_p0, %p216_p2  ;;  %s239_s10 = sshll.u32 %s1744_s9, 4  ;;  %s1855_s10 = int_to_ptr.vmem [resolvable:$true] %s239_s10 }
  0x12   : > { %s255_s13 = sshll.u32 %s1745_s12, 4  ;;  %s1512_s14 = scalar_lea.vmem %s230_s29, 64  ;;  %s1863_s13 = int_to_ptr.vmem [resolvable:$true] %s255_s13 }
  0x13   : > { %s2250_s8 = scalar_select %p1848_p3, 1, 0 }
  0x14   : > { %p1386_p5 = pneg %p1848_p3  ;;  %p1513_p8 = scmp.ne.s32.totalorder %s230_s29, %s1512_s14 }
  0x15   : > { %p1520_p11 = scmp.lt.s32.totalorder %s230_s29, %s230_s29  ;;  %p1521_p12 = scmp.lt.s32.totalorder %s1512_s14, %s1512_s14 }
  0x16   : > { %p1859_p6 = pnand %p1386_p5, %p2243_p1 }
  0x17   : > { %p1522_p13 = por %p1521_p12, %p1520_p11 }
  0x18   : > { %p1503_p7 = pneg %p1859_p6 }
  0x1a   : > { %p1515_p9 = pnand %p1513_p8, %p1503_p7 }
  0x1c   : > { %p1516_p10 = pneg %p1515_p9 }
  0x1e   : > { %p1523_p0 = pnand %p1522_p13, %p1516_p10 }
  0x20   : > { %1526 = shalt.err (!%p1523_p0)
}
  0x21   : > { %s2252_s2 = sld [smem:[#allocation21_spill]]  ;;  %s1538_s17 = scalar_lea.vmem %s1855_s10, 576 }
  0x22   : > { %p1539_p2 = scmp.ne.s32.totalorder %s1855_s10, %s1538_s17  ;;  %p1546_p9 = scmp.lt.s32.totalorder %s1855_s10, %s1855_s10 }
  0x23   : > { %p1547_p10 = scmp.lt.s32.totalorder %s1538_s17, %s1538_s17 }
  0x24   : > { %p1541_p5 = pnand %p1539_p2, %p1503_p7 }
  0x25   : > { %p1548_p11 = por %p1547_p10, %p1546_p9 }
  0x26   : > { %p1542_p8 = pneg %p1541_p5 }
  0x27   : > { %1389 = dma.hbm_to_vmem [thread:$0]  (!%p1859_p6), %s2252_s2, 64, %s230_s29, [#allocation6]  }
  0x28   : > { %p1549_p12 = pnand %p1548_p11, %p1542_p8 }
  0x2a   : > { %1552 = shalt.err (!%p1549_p12)
}
  0x2b   : > { %s1746_s18 = smov 64   ;;  %s1747_s19 = smov 4  }
  0x2c   : > { %s2253_s3 = sld [smem:[#allocation22_spill]]  ;;  %s1564_s22 = scalar_lea.vmem %s1863_s13, 1152 }
  0x2d   : > { %p1565_p13 = scmp.ne.s32.totalorder %s1863_s13, %s1564_s22  ;;  %p1572_p5 = scmp.lt.s32.totalorder %s1863_s13, %s1863_s13 }
  0x2e   : > { %p1573_p8 = scmp.lt.s32.totalorder %s1564_s22, %s1564_s22 }
  0x2f   : > { %p1567_p0 = pnand %p1565_p13, %p1503_p7 }
  0x30   : > { %p1574_p9 = por %p1573_p8, %p1572_p5 }
  0x31   : > { %p1568_p2 = pneg %p1567_p0 }
  0x32   : > { %1392 = dma.hbm_to_vmem [thread:$0]  (!%p1859_p6), %s2253_s3, 576, %s1855_s10, [#allocation9], %s1746_s18, %s1746_s18, %s1747_s19  }
  0x33   : > { %p1575_p10 = pnand %p1574_p9, %p1568_p2 }
  0x35   : > { %1578 = shalt.err (!%p1575_p10)
}
  0x36   : > { %s1748_s23 = smov 128   ;;  %s1749_s28 = smov 8  }
  0x37   : > { %1395 = dma.hbm_to_vmem [thread:$0]  (!%p1859_p6), %s2240_s5, 1152, %s1863_s13, [#allocation9], %s1748_s23, %s1748_s23, %s1749_s28  }
  0x38   : > { %s1750_s10 = smov [#allocation11]  }
  0x39   : > { %s268_s12 = sshll.u32 %s1750_s10, 4  ;;  %s269_s12 = int_to_ptr.vmem [resolvable:$true] %s268_s12 }
  0x3a   : > { %s1590_s14 = scalar_lea.vmem %s269_s12, 2048  ;;  %p1598_p0 = scmp.lt.s32.totalorder %s269_s12, %s269_s12 }
  0x3b   : > { %p1591_p11 = scmp.ne.s32.totalorder %s269_s12, %s1590_s14  ;;  %p1599_p2 = scmp.lt.s32.totalorder %s1590_s14, %s1590_s14 }
  0x3d   : > { %p1593_p12 = pnand %p1591_p11, %p1503_p7  ;;  %p1600_p5 = por %p1599_p2, %p1598_p0 }
  0x3f   : > { %p1594_p13 = pneg %p1593_p12 }
  0x41   : > { %p1601_p8 = pnand %p1600_p5, %p1594_p13 }
  0x43   : > { %1604 = shalt.err (!%p1601_p8)
}
  0x44   : > { %s1751_s15 = smov 256   ;;  %s1752_s13 = smov 16  }
  0x45   : > { %1398 = dma.hbm_to_vmem [thread:$0]  (!%p1859_p6), %s2241_s6, 2048, %s269_s12, [#allocation12], %s1751_s15, %s1751_s15, %s1752_s13  }
  0x46   : > { %s1315_s18 = sadd.s32 4294967294, %s1741_s27   ;;  %s1911_s19 = sadd.s32 1, %s1741_s27  }
  0x47   : > { %s32_s20 = ssub.s32 %s1741_s27, %s1911_s19  ;;  %s35_s21 = sadd.s32 1, %s1737_s26 }
  0x48   : > { %p33_p7 = scmp.eq.s32.totalorder %s32_s20, 0  ;;  %p42_p9 = scmp.ne.s32.totalorder %s1737_s26, %s1733_s25 }
  0x49   : > { %p43_p10 = scmp.eq.s32.totalorder %s1741_s27, 0  ;;  %p48_p11 = scmp.ne.s32.totalorder %s1733_s25, %s1729_s24 }
  0x4a   : > { %s1922_s22 = scalar_select %p33_p7, %s1737_s26, %s35_s21  }
  0x4b   : > { %p1924_p12 = por %p43_p10, %p42_p9  ;;  %p1930_p6 = por %p2243_p1, %p48_p11 }
  0x4c   : > { %p203_p13 = scmp.eq.s32.totalorder %s1843_s30, 1  ;;  %p209_p0 = scmp.eq.s32.totalorder %s1315_s18, 1 }
  0x4d   : > { %s2255_s23 = scalar_select %p1930_p6, 1, 0 }
  0x4e   : > { %p1414_p2 = scmp.lt.s32.totalorder %s1741_s27, 2  ;;  %s1937_s28 = sand.u32 1, %s1737_s26  }
  0x4f   : > { %p1939_p5 = por %p203_p13, %p42_p9  ;;  %p1943_p8 = por %p209_p0, %p48_p11 }
  0x50   : > { %s1322_s10 = sshll.u32 %s1937_s28, 3  ;;  %s1323_s12 = sshll.u32 %s1741_s27, 7 }
  0x51   : > { %s2256_s29 = scalar_select %p1939_p5, 1, 0 }
  0x52   : > { %s2257_s9 = scalar_select %p1943_p8, 1, 0 }
  0x53   : > { %s2258_s0 = sld [smem:[#allocation20_spill]]  ;;  %s286_s16 = scalar_lea.vmem [#allocation2], %s1322_s10 }
  0x54   : > { %s293_s17 = sshll.u32 %s286_s16, 4  ;;  %p1958_p7 = pnand %p1414_p2, %p1924_p12  ;;  %s1954_s17 = int_to_ptr.vmem [resolvable:$true] %s293_s17 }
  0x55   : > { %s283_s2 = scalar_lea.sflag [#allocation3], %s1937_s28 }
  0x56   : > { %p1607_p10 = pneg %p1958_p7 }
  0x59   : > { %s1952_s13 = scalar_lea.hbm %s2258_s0, %s1323_s12  ;;  %s1610_s11 = scalar_lea.hbm %s2258_s0, 256 }
  0x5a   : > { %s1605_s14 = scalar_lea.hbm %s1952_s13, 128  ;;  %p1611_p12 = scmp.lt.s32.totalorder %s1952_s13, %s2258_s0 }
  0x5b   : > { %p1606_p9 = scmp.ne.s32.totalorder %s1952_s13, %s1605_s14  ;;  %p1612_p0 = scmp.lt.s32.totalorder %s1610_s11, %s1605_s14 }
  0x5d   : > { %p1608_p11 = pnand %p1607_p10, %p1606_p9  ;;  %p1613_p2 = por %p1612_p0, %p1611_p12 }
  0x5f   : > { %p1609_p13 = pneg %p1608_p11 }
  0x61   : > { %p1614_p4 = pnand %p1613_p2, %p1609_p13 }
  0x63   : > { %1617 = shalt.err (!%p1614_p4)
}
  0x64   : > { %s1618_s20 = scalar_lea.vmem %s1954_s17, 128  ;;  %s1753_s10 = smov [#allocation2]  }
  0x65   : > { %p1619_p1 = scmp.ne.s32.totalorder %s1954_s17, %s1618_s20  ;;  %s1623_s12 = sshll.u32 %s1753_s10, 4  ;;  %s1624_s12 = int_to_ptr.vmem [resolvable:$false] %s1623_s12 }
  0x66   : > { %s1625_s21 = scalar_lea.vmem %s1624_s12, 256  ;;  %p1626_p8 = scmp.lt.s32.totalorder %s1954_s17, %s1624_s12 }
  0x67   : > { %p1621_p9 = pnand %p1619_p1, %p1607_p10  ;;  %p1627_p5 = scmp.lt.s32.totalorder %s1625_s21, %s1618_s20 }
  0x69   : > { %p1622_p11 = pneg %p1621_p9  ;;  %p1628_p6 = por %p1627_p5, %p1626_p8 }
  0x6b   : > { %p1629_p12 = pnand %p1628_p6, %p1622_p11 }
  0x6d   : > { %1632 = shalt.err (!%p1629_p12)
}
  0x6e   : > { %1402 = dma.hbm_to_vmem [thread:$0]  (!%p1958_p7), %s1952_s13, 128, %s1954_s17, %s283_s2  }
  0x6f   : > { %s1348_s14 = sshll.u32 %s1741_s27, 8  ;;  %s2260_s10 = sshll.u32 %s1937_s28, 4 }
  0x70   : > { %s1993_s16 = scalar_lea.hbm %s2236_s1, %s1348_s14  ;;  %s304_s20 = scalar_lea.vmem [#allocation5], %s2260_s10 }
  0x71   : > { %s312_s21 = sshll.u32 %s304_s20, 4  ;;  %s2261_s12 = sand.u32 1, %s1741_s27   ;;  %s313_s21 = int_to_ptr.vmem [resolvable:$true] %s312_s21 }
  0x72   : > { %s301_s0 = scalar_lea.sflag [#allocation6], %s2261_s12  ;;  %s1633_s3 = scalar_lea.hbm %s1993_s16, 256 }
  0x73   : > { %p1634_p1 = scmp.ne.s32.totalorder %s1993_s16, %s1633_s3  ;;  %s1638_s17 = scalar_lea.hbm %s2236_s1, 512 }
  0x74   : > { %p1639_p5 = scmp.lt.s32.totalorder %s1993_s16, %s2236_s1  ;;  %p1640_p8 = scmp.lt.s32.totalorder %s1638_s17, %s1633_s3 }
  0x75   : > { %p1636_p4 = pnand %p1634_p1, %p1607_p10 }
  0x76   : > { %p1641_p13 = por %p1640_p8, %p1639_p5 }
  0x77   : > { %p1637_p6 = pneg %p1636_p4 }
  0x79   : > { %p1642_p0 = pnand %p1641_p13, %p1637_p6 }
  0x7b   : > { %1645 = shalt.err (!%p1642_p0)
}
  0x7c   : > { %s1646_s11 = scalar_lea.vmem %s313_s21, 256  ;;  %s1754_s15 = smov [#allocation5]  }
  0x7d   : > { %p1647_p2 = scmp.ne.s32.totalorder %s313_s21, %s1646_s11  ;;  %s1651_s10 = sshll.u32 %s1754_s15, 4  ;;  %s1652_s10 = int_to_ptr.vmem [resolvable:$false] %s1651_s10 }
  0x7e   : > { %s1653_s20 = scalar_lea.vmem %s1652_s10, 512  ;;  %p1654_p12 = scmp.lt.s32.totalorder %s313_s21, %s1652_s10 }
  0x7f   : > { %p1649_p9 = pnand %p1647_p2, %p1607_p10  ;;  %p1655_p1 = scmp.lt.s32.totalorder %s1653_s20, %s1646_s11 }
  0x81   : > { %p1650_p11 = pneg %p1649_p9  ;;  %p1656_p4 = por %p1655_p1, %p1654_p12 }
  0x83   : > { %p1657_p3 = pnand %p1656_p4, %p1650_p11 }
  0x85   : > { %1660 = shalt.err (!%p1657_p3)
}
  0x86   : > { %1405 = dma.hbm_to_vmem [thread:$0]  (!%p1958_p7), %s1993_s16, 256, %s313_s21, %s301_s0  }
  0x87   : > { %p2262_p6 = scmp.ne.s32.totalorder %s2250_s8, 0 }
  0x88   : > { %s2020_s3 = sand.u32 (!%p2262_p6), 1, %s1733_s25   ;;  %p2263_p10 = scmp.ne.s32.totalorder (!%p2262_p6), %s2255_s23, 0 }
  0x89   : > { %321 = sbr.rel (%p2262_p6) target bundleno = 1300 (0x514), region = 48  ;;  %s1328_s12 = sshll.u32 (!%p2262_p6), %s2020_s3, 3 }
  0x8a   : > { %s324_s2 = scalar_lea.sflag (!%p2262_p6), [#allocation3], %s2020_s3  ;;  %s327_s13 = scalar_lea.vmem (!%p2262_p6), [#allocation2], %s1328_s12 }
  0x8e   : > { %1704 = dma.done.wait (%p2263_p10), %s324_s2, 128  }
  0x8f   : > { %1706 = vsyncadd (%p2263_p10), %s324_s2, 4294967168  ;;  %s332_s0 = sand.u32 1, %s1843_s30   ;;  %s1329_s8 = sshll.u32 %s2020_s3, 4 }
  0x90   : > { %s333_s18 = scalar_lea.sflag [#allocation6], %s332_s0  ;;  %s2032_s16 = scalar_lea.vmem [#allocation5], %s1329_s8 }
  0x91   : > { %1708 = dma.done.wait (%p2263_p10), %s333_s18, 256  }
  0x92   : > { %1710 = vsyncadd (%p2263_p10), %s333_s18, 4294967040  ;;  %p2264_p3 = scmp.eq.s32.totalorder %s1843_s30, 0 }
  0x94   : > { %1712 = dma.done.wait (%p2264_p3), [#allocation6], 64   ;;  %p2265_p7 = pmov %p2264_p3 }
  0x95   : > { %p2266_p5 = pmov %p2264_p3 }
  0x96   : > { %1714 = vsyncadd (%p2265_p7), [#allocation6], 4294967232 }
  0x97   : > { %1716 = dma.done.wait (%p2266_p5), [#allocation9], 1728   ;;  %p2267_p8 = pmov %p2264_p3 }
  0x98   : > { %p2268_p13 = pmov %p2264_p3 }
  0x99   : > { %1718 = vsyncadd (%p2267_p8), [#allocation9], 4294965568 }
  0x9a   : > { %1720 = dma.done.wait (%p2268_p13), [#allocation12], 2048   ;;  %p2269_p0 = pmov %p2264_p3 }
  0x9b   : > { %v1755_v0 = vmov 0.0   ;;  %vm1756_vm0 = vmmov 0   ;;  %v1757_v1 = vmov 12   ;;  %v1758_v2 = vmov 13   ;;  %v388_v3 = vld [vmem:[%s327_s13] sm:$0xff]  ;;  %s1759_s23 = smov 1  }
  0x9c   : > { %1722 = vsyncadd (%p2269_p0), [#allocation12], 4294965248  ;;  %1354 = vmatprep.subr.mxu1 %v1755_v0  ;;  %1356 = vmatprep.mubr.msk.f32.mxu1 %vm1756_vm0, %v1755_v0  ;;  %vm404_vm1 = vcmask 64512   ;;  %v2054_v4 = vld [vmem:[#allocation7] sm:$0xf]  ;;  %s1760_s21 = smov 2  }
  0x9d   : > { %1488 = vset.pattern.permute.xlu0 %v1757_v1  ;;  %1489 = vset.pattern.permute.xlu1 %v1758_v2  ;;  %v391_v5 = vld [vmem:[#allocation8 + $0x4] sm:$0xf]  ;;  %v392_v6 = vld [vmem:[#allocation8 + $0x8] sm:$0xf]  ;;  %v395_v7 = vld [vmem:[#allocation8 + $0x14] sm:$0xf] }
  0x9e   : > { %732 = vmatprep.mubr.f32.mxu0 %v1755_v0  ;;  %1355 = vmatpush3.msra.mxu1 %v388_v3  ;;  %s1761_s17 = smov 10   ;;  %v397_v8 = vld [vmem:[#allocation8 + $0x1c] sm:$0xf]  ;;  %s1762_s14 = smov 17   ;;  %v393_v14 = vld [vmem:[#allocation8 + $0xc] sm:$0xf] }
  0x9f   : > { %495 = vrot.lane.b32.xlu1 %v391_v5, %s1759_s23  ;;  %1357 = vmatmul.mubr.msk.f32.vlgmr.msra.gmra.mxu1 %vm404_vm1, %v2054_v4  ;;  %s1763_s28 = smov 9   ;;  %s1764_s11 = smov 8   ;;  %v396_v15 = vld [vmem:[#allocation8 + $0x18] sm:$0xf]  ;;  %v398_v16 = vld [vmem:[#allocation8 + $0x20] sm:$0xf] }
  0xa0   : > { %401 = vperm.xlu0 %1488, %v2054_v4   ;;  %1359 = vmatprep.subr.mxu1 %v1755_v0  ;;  %s1765_s15 = smov 16   ;;  %s1766_s10 = smov 18   ;;  %v394_v21 = vld [vmem:[#allocation8 + $0x10] sm:$0xf]  ;;  %vm482_vm2 = vcmask 72704   ;;  %vm484_vm3 = vcmask 596992  }
  0xa1   : > { %1361 = vmatprep.mubr.msk.f32.mxu1 %vm1756_vm0, %v1755_v0  ;;  %v390_v26 = vld [vmem:[#allocation8] sm:$0xf]  ;;  %s1767_s20 = smov 126   ;;  %s1768_s12 = smov 127   ;;  %v2078_v41 = vld [vmem:[%s2239_s4] sm:$0xf] }
  0xa2   : > { %s1769_s2 = smov 118   ;;  %s1770_s13 = smov 120   ;;  %v743_v42 = vld [vmem:[#allocation10 + $0x8] sm:$0xff]  ;;  %v744_v44 = vld [vmem:[#allocation10 + $0x10] sm:$0xff]  ;;  %vm573_vm4 = vcmask 1043456   ;;  %vm570_vm5 = vcmask 31744  }
  0xa3   : > { %505 = vrot.lane.b32.xlu1 %v392_v6, %s1760_s21  ;;  %s1771_s0 = smov 111   ;;  %s1772_s18 = smov 112   ;;  %v863_v43 = vcombine.high %v743_v42, %v743_v42  ;;  %v893_v45 = vcombine.high %v744_v44, %v744_v44  ;;  %v740_v61 = vld [vmem:[%s2032_s16 + $0x8] sm:$0xff]  ;;  %v739_v62 = vld [vmem:[%s2032_s16] sm:$0xff]  ;;  %vm837_vm6 = vcmask 138240   ;;  %vm868_vm7 = vcmask 7168  }
  0xa4   : > { %v745_v63 = vld [vmem:[#allocation10 + $0x18] sm:$0xff]  ;;  %v747_v2 = vld [vmem:[#allocation10 + $0x28] sm:$0xff]  ;;  %s1774_s16 = smov 32   ;;  %vm898_vm8 = vcmask 15360   ;;  %vm928_vm9 = vcmask 130048   ;;  %vm958_vm10 = vcmask 146432  }
  0xa5   : > { %v923_v1 = vcombine.high %v745_v63, %v745_v63  ;;  %v953_v3 = vcombine.high %v747_v2, %v747_v2  ;;  %vm988_vm11 = vcmask 261120   ;;  %vm1018_vm12 = vcmask 269312   ;;  %p2270_p9 = scmp.ne.s32.totalorder %s2256_s29, 0 }
  0xa6   : > { %vm1048_vm13 = vcmask 277504   ;;  %vm885_vm14 = vcmask 1039360   ;;  %vm915_vm15 = vcmask 1031168   ;;  %vm945_vm0 = vcmask 916480  }
  0xa7   : > { %525 = vrot.lane.b32.xlu1 %v395_v7, %s1761_s17  ;;  %s1773_s17 = smov 110  }
  0xab   : > { %545 = vrot.lane.b32.xlu1 %v397_v8, %s1762_s14 }
  0xaf   : > { %488 = vperm.xlu1 %1489, %v2054_v4  }
 0x111   : > { %v496_v17 = vpop.permute.xlu1 %495 }
 0x115   : > { %v506_v18 = vpop.permute.xlu1 %505 }
 0x119   : > { %v526_v19 = vpop.permute.xlu1 %525 }
 0x11b   : > { %v402_v9 = vpop.permute.xlu0 %401 }
 0x11d   : > { %v546_v20 = vpop.permute.xlu1 %545 }
 0x12a   : > { %v489_v24 = vpop.permute.xlu1 %488 }
 0x15f   : > { %v473_v10 = vpop.f32.mrf.mxu1 }
 0x160   : > { %v474_v11 = vadd.f32 %v473_v10, %v402_v9 }
 0x161   : > { %v1358_v12 = vpop.f32.mrf.mxu1 }
 0x162   : > { %v477_v13 = vmax.f32 %v474_v11, 0.0  ;;  %v748_v12 = vld [vmem:[#allocation10 + $0x30] sm:$0xff] }
 0x164   : > { %479 = vrot.lane.b32.xlu0 %v477_v13, %s1763_s28  ;;  %v486_v22 = vmul.f32 %v477_v13, %v394_v21 }
 0x166   : > { %v491_v30 = vadd.f32 %v489_v24, %v486_v22 }
 0x168   : > { %515 = vrot.lane.b32.xlu0 %v393_v14, %s1764_s11  ;;  %v983_v14 = vcombine.high %v748_v12, %v748_v12 }
 0x16c   : > { %535 = vrot.lane.b32.xlu0 %v396_v15, %s1765_s15  ;;  %v749_v15 = vld [vmem:[#allocation10 + $0x38] sm:$0xff] }
 0x170   : > { %555 = vrot.lane.b32.xlu0 %v398_v16, %s1766_s10  ;;  %v1013_v16 = vcombine.high %v749_v15, %v749_v15 }
 0x1d6   : > { %v480_v23 = vpop.permute.xlu0 %479 }
 0x1d7   : > { %v483_v25 = vsel %vm482_vm2, 0.0, %v480_v23  ;;  %vm1005_vm2 = vcmask 785408  }
 0x1d8   : > { %v485_v27 = vsel %vm484_vm3, %v483_v25, 0.0  ;;  %vm1035_vm3 = vcmask 777216  }
 0x1d9   : > { %v508_v28 = vmul.f32 %v506_v18, %v485_v27  ;;  %v498_v29 = vmul.f32 %v496_v17, %v485_v27  ;;  %v492_v32 = vmul.f32 %v485_v27, %v390_v26  ;;  %v528_v35 = vmul.f32 %v526_v19, %v485_v27  ;;  %v750_v17 = vld [vmem:[#allocation10 + $0x40] sm:$0xff] }
 0x1da   : > { %v516_v31 = vpop.permute.xlu0 %515  ;;  %v548_v38 = vmul.f32 %v546_v20, %v485_v27  ;;  %v1043_v18 = vcombine.high %v750_v17, %v750_v17  ;;  %v1777_v19 = vmov 14  }
 0x1db   : > { %510 = vrot.lane.b32.xlu1 %v508_v28, %s1767_s20  ;;  %500 = vrot.lane.b32.xlu0 %v498_v29, %s1768_s12  ;;  %v493_v33 = vadd.f32 %v492_v32, %v491_v30  ;;  %v518_v34 = vmul.f32 %v516_v31, %v485_v27 }
 0x1de   : > { %v536_v36 = vpop.permute.xlu0 %535 }
 0x1df   : > { %530 = vrot.lane.b32.xlu1 %v528_v35, %s1769_s2  ;;  %520 = vrot.lane.b32.xlu0 %v518_v34, %s1770_s13  ;;  %v538_v37 = vmul.f32 %v536_v36, %v485_v27 }
 0x1e2   : > { %v556_v39 = vpop.permute.xlu0 %555 }
 0x1e3   : > { %550 = vrot.lane.b32.xlu1 %v548_v38, %s1771_s0  ;;  %540 = vrot.lane.b32.xlu0 %v538_v37, %s1772_s18  ;;  %v558_v40 = vmul.f32 %v556_v39, %v485_v27 }
 0x1e7   : > { %560 = vrot.lane.b32.xlu0 %v558_v40, %s1773_s17  ;;  %568 = vrot.lane.b32.xlu1 %v2054_v4, %s1770_s13 }
 0x1eb   : > { %753 = vperm.xlu0 %1488, %v2078_v41   ;;  %864 = vrot.lane.b32.xlu1 %v743_v42, %s1759_s23 }
 0x1ef   : > { %866 = vrot.lane.b32.xlu0 %v863_v43, %s1759_s23  ;;  %894 = vrot.lane.b32.xlu1 %v744_v44, %s1760_s21  ;;  %s1775_s23 = smov 33  }
 0x1f0   : > { %1491 = vset.pattern.permute.xlu0 %v1777_v19 }
 0x1f3   : > { %896 = vrot.lane.b32.xlu0 %v893_v45, %s1760_s21  ;;  %924 = vrot.lane.b32.xlu1 %v745_v63, %s1765_s15  ;;  %s1776_s21 = smov 34   ;;  %v746_v45 = vld [vmem:[#allocation10 + $0x20] sm:$0xff] }
 0x1f7   : > { %926 = vrot.lane.b32.xlu0 %v923_v1, %s1765_s15  ;;  %954 = vrot.lane.b32.xlu1 %v747_v2, %s1766_s10  ;;  %s1779_s15 = smov 95  }
 0x1fb   : > { %956 = vrot.lane.b32.xlu0 %v953_v3, %s1766_s10  ;;  %s1780_s10 = smov 94  }
 0x24d   : > { %v511_v46 = vpop.permute.xlu1 %510  ;;  %v501_v47 = vpop.permute.xlu0 %500 }
 0x24e   : > { %v503_v48 = vadd.f32 %v501_v47, %v493_v33 }
 0x250   : > { %v513_v49 = vadd.f32 %v511_v46, %v503_v48 }
 0x251   : > { %v531_v50 = vpop.permute.xlu1 %530  ;;  %v521_v51 = vpop.permute.xlu0 %520 }
 0x252   : > { %v523_v52 = vadd.f32 %v521_v51, %v513_v49  ;;  %v742_v49 = vld [vmem:[#allocation10] sm:$0xff] }
 0x254   : > { %v533_v53 = vadd.f32 %v531_v50, %v523_v52  ;;  %v845_v50 = vcombine.high %v746_v45, %v746_v45 }
 0x255   : > { %v541_v54 = vpop.permute.xlu0 %540  ;;  %v551_v55 = vpop.permute.xlu1 %550 }
 0x256   : > { %v543_v56 = vadd.f32 %v541_v54, %v533_v53  ;;  %v856_v54 = vcombine.high %v742_v49, %v742_v49 }
 0x258   : > { %v553_v57 = vadd.f32 %v551_v55, %v543_v56 }
 0x259   : > { %v561_v58 = vpop.permute.xlu0 %560  ;;  %v569_v60 = vpop.permute.xlu1 %568 }
 0x25a   : > { %v563_v59 = vadd.f32 %v561_v58, %v553_v57 }
 0x25c   : > { %1360 = vmatpush3.msk.msra.mxu1 %vm573_vm4, %v563_v59 }
 0x25d   : > { %1362 = vmatmul.mubr.msk.f32.vlgmr.msra.gmra.mxu1 %vm570_vm5, %v569_v60  ;;  %788 = vmatprep.subr.mxu1 %v740_v61  ;;  %v865_v20 = vpop.permute.xlu1 %864 }
 0x25e   : > { %789 = vmatpush1.msra.mxu1 %v739_v62  ;;  %822 = vmatprep.mubr.f32.mxu1 %v1755_v0 }
 0x261   : > { %1339 = vmatmul.mubr.msk.f32.vlgmr.msra.gmra.mxu1 %vm404_vm1, %v2078_v41  ;;  %v895_v21 = vpop.permute.xlu1 %894  ;;  %vm975_vm1 = vcmask 900096  }
 0x262   : > { %1150 = vmatprep.mubr.f32.mxu1 %v1755_v0 }
 0x265   : > { %v925_v23 = vpop.permute.xlu1 %924 }
 0x266   : > { %v754_v7 = vpop.permute.xlu0 %753 }
 0x269   : > { %v955_v25 = vpop.permute.xlu1 %954 }
 0x26a   : > { %v867_v22 = vpop.permute.xlu0 %866 }
 0x26b   : > { %v869_v42 = vsel %vm868_vm7, %v865_v20, %v867_v22  ;;  %vm664_vm7 = vcmask 523264  }
 0x26e   : > { %v897_v24 = vpop.permute.xlu0 %896 }
 0x26f   : > { %v899_v46 = vsel %vm898_vm8, %v895_v21, %v897_v24 }
 0x272   : > { %v927_v26 = vpop.permute.xlu0 %926 }
 0x273   : > { %v929_v52 = vsel %vm928_vm9, %v925_v23, %v927_v26 }
 0x276   : > { %v957_v31 = vpop.permute.xlu0 %956 }
 0x277   : > { %v959_v59 = vsel %vm958_vm10, %v955_v25, %v957_v31 }
 0x31d   : > { %v2097_v5 = vpop.f32.mrf.mxu1 }
 0x31f   : > { %v1363_v6 = vpop.f32.mrf.mxu1 }
 0x321   : > { %v824_v8 = vpop.f32.mrf.mxu1 }
 0x322   : > { %v2099_v9 = vadd.f32 %v824_v8, %v754_v7 }
 0x323   : > { %v826_v0 = vpop.f32.mrf.mxu1 }
 0x324   : > { %v829_v10 = vmax.f32 %v2099_v9, 0.0  ;;  %v2102_v11 = vadd.f32 %v826_v0, %v754_v7  ;;  %v663_v0 = vld [vmem:[#allocation11 + $0x78] sm:$0xff] }
 0x325   : > { %684 = vmatprep.subr.mxu0 %v663_v0 }
 0x326   : > { %v830_v13 = vmax.f32 %v2102_v11, 0.0  ;;  %833 = vrot.lane.b32.xlu1 %v829_v10, %s1762_s14  ;;  %v847_v57 = vmul.f32 %v829_v10, %v746_v45  ;;  %v662_v10 = vld [vmem:[#allocation11 + $0x70] sm:$0xff]  ;;  %v661_v11 = vld [vmem:[#allocation11 + $0x68] sm:$0xff] }
 0x327   : > { %685 = vmatpush1.msra.mxu0 %v662_v10 }
 0x328   : > { %835 = vrot.lane.b32.xlu0 %v830_v13, %s1762_s14  ;;  %s1778_s14 = smov 96   ;;  %v848_v58 = vmul.f32 %v845_v50, %v830_v13  ;;  %686 = vmatprep.subr.mxu0 %v661_v11 }
 0x32a   : > { %984 = vrot.lane.b32.xlu1 %v748_v12, %s1774_s16 }
 0x32c   : > { %986 = vrot.lane.b32.xlu0 %v983_v14, %s1774_s16 }
 0x32e   : > { %1014 = vrot.lane.b32.xlu1 %v749_v15, %s1775_s23 }
 0x330   : > { %1016 = vrot.lane.b32.xlu0 %v1013_v16, %s1775_s23  ;;  %v660_v16 = vld [vmem:[#allocation11 + $0x60] sm:$0xff] }
 0x331   : > { %687 = vmatpush1.msra.mxu0 %v660_v16 }
 0x332   : > { %1044 = vrot.lane.b32.xlu1 %v750_v17, %s1776_s21  ;;  %v659_v17 = vld [vmem:[#allocation11 + $0x58] sm:$0xff] }
 0x333   : > { %688 = vmatprep.subr.mxu0 %v659_v17 }
 0x334   : > { %1046 = vrot.lane.b32.xlu0 %v1043_v18, %s1776_s21  ;;  %v658_v18 = vld [vmem:[#allocation11 + $0x50] sm:$0xff] }
 0x335   : > { %689 = vmatpush1.msra.mxu0 %v658_v18 }
 0x336   : > { %850 = vperm.xlu1 %1489, %v2078_v41  }
 0x33a   : > { %1490 = vset.pattern.permute.xlu1 %v1777_v19 }
 0x398   : > { %v834_v27 = vpop.permute.xlu1 %833 }
 0x399   : > { %v2113_v28 = vsel %vm837_vm6, 0.0, %v834_v27 }
 0x39a   : > { %v903_v29 = vmul.f32 %v895_v21, %v2113_v28  ;;  %v873_v30 = vmul.f32 %v865_v20, %v2113_v28  ;;  %v963_v33 = vmul.f32 %v955_v25, %v2113_v28  ;;  %v933_v34 = vmul.f32 %v925_v23, %v2113_v28  ;;  %v836_v35 = vpop.permute.xlu0 %835  ;;  %v657_v21 = vld [vmem:[#allocation11 + $0x48] sm:$0xff]  ;;  %v656_v23 = vld [vmem:[#allocation11 + $0x40] sm:$0xff] }
 0x39b   : > { %v2126_v39 = vsel %vm837_vm6, %v834_v27, %v836_v35  ;;  %v2129_v40 = vsel %vm837_vm6, %v836_v35, 0.0  ;;  %v858_v60 = vmul.f32 %v2113_v28, %v742_v49  ;;  %690 = vmatprep.subr.mxu0 %v657_v21  ;;  %v654_v27 = vld [vmem:[#allocation11 + $0x30] sm:$0xff]  ;;  %v648_v35 = vld [vmem:[#allocation11] sm:$0xff]  ;;  %vm1065_vm6 = vcmask 769024  }
 0x39c   : > { %909 = vrot.lane.b32.xlu1 %v903_v29, %s1767_s20  ;;  %879 = vrot.lane.b32.xlu0 %v873_v30, %s1768_s12  ;;  %v985_v32 = vpop.permute.xlu1 %984  ;;  %v874_v43 = vmul.f32 %v869_v42, %v2126_v39  ;;  %v875_v44 = vmul.f32 %v867_v22, %v2129_v40  ;;  %v905_v47 = vmul.f32 %v897_v24, %v2129_v40  ;;  %v655_v24 = vld [vmem:[#allocation11 + $0x38] sm:$0xff]  ;;  %v653_v29 = vld [vmem:[#allocation11 + $0x28] sm:$0xff]  ;;  %v652_v30 = vld [vmem:[#allocation11 + $0x20] sm:$0xff] }
 0x39d   : > { %v993_v38 = vmul.f32 %v985_v32, %v2113_v28  ;;  %v904_v48 = vmul.f32 %v899_v46, %v2126_v39  ;;  %v934_v55 = vmul.f32 %v929_v52, %v2126_v39  ;;  %v935_v56 = vmul.f32 %v927_v26, %v2129_v40  ;;  %691 = vmatpush1.msra.mxu0 %v656_v23 }
 0x39e   : > { %v987_v51 = vpop.permute.xlu0 %986  ;;  %v859_v61 = vmul.f32 %v856_v54, %v2126_v39  ;;  %v965_v3 = vmul.f32 %v957_v31, %v2129_v40  ;;  %v964_v6 = vmul.f32 %v959_v59, %v2126_v39  ;;  %692 = vmatprep.subr.mxu0 %v655_v24 }
 0x39f   : > { %v989_v7 = vsel %vm988_vm11, %v985_v32, %v987_v51  ;;  %v995_v13 = vmul.f32 %v987_v51, %v2129_v40  ;;  %693 = vmatpush1.msra.mxu0 %v654_v27  ;;  %v651_v32 = vld [vmem:[#allocation11 + $0x18] sm:$0xff] }
 0x3a0   : > { %969 = vrot.lane.b32.xlu1 %v963_v33, %s1773_s17  ;;  %939 = vrot.lane.b32.xlu0 %v933_v34, %s1772_s18  ;;  %v1015_v36 = vpop.permute.xlu1 %1014  ;;  %v994_v12 = vmul.f32 %v989_v7, %v2126_v39  ;;  %v650_v33 = vld [vmem:[#allocation11 + $0x10] sm:$0xff]  ;;  %v649_v34 = vld [vmem:[#allocation11 + $0x8] sm:$0xff] }
 0x3a1   : > { %v1023_v37 = vmul.f32 %v1015_v36, %v2113_v28  ;;  %694 = vmatprep.subr.mxu0 %v653_v29 }
 0x3a2   : > { %v1017_v63 = vpop.permute.xlu0 %1016  ;;  %695 = vmatpush1.msra.mxu0 %v652_v30 }
 0x3a3   : > { %v1019_v14 = vsel %vm1018_vm12, %v1015_v36, %v1017_v63  ;;  %v1025_v20 = vmul.f32 %v1017_v63, %v2129_v40  ;;  %696 = vmatprep.subr.mxu0 %v651_v32 }
 0x3a4   : > { %999 = vrot.lane.b32.xlu0 %v993_v38, %s1778_s14  ;;  %1029 = vrot.lane.b32.xlu1 %v1023_v37, %s1779_s15  ;;  %v2141_v53 = vpop.permute.xlu1 %1044  ;;  %v1024_v19 = vmul.f32 %v1019_v14, %v2126_v39 }
 0x3a5   : > { %v1053_v31 = vmul.f32 %v2141_v53, %v2113_v28  ;;  %697 = vmatpush1.msra.mxu0 %v650_v33 }
 0x3a6   : > { %v1047_v15 = vpop.permute.xlu0 %1046  ;;  %698 = vmatprep.subr.mxu0 %v649_v34 }
 0x3a7   : > { %v1049_v22 = vsel %vm1048_vm13, %v2141_v53, %v1047_v15  ;;  %v1055_v26 = vmul.f32 %v1047_v15, %v2129_v40  ;;  %699 = vmatpush1.msra.mxu0 %v648_v35 }
 0x3a8   : > { %881 = vrot.lane.b32.xlu0 %v874_v43, %s1768_s12  ;;  %883 = vrot.lane.b32.xlu1 %v875_v44, %s1768_s12  ;;  %v1054_v25 = vmul.f32 %v1049_v22, %v2126_v39  ;;  %s1349_s12 = sshll.u32 %s1843_s30, 8 }
 0x3ac   : > { %913 = vrot.lane.b32.xlu0 %v905_v47, %s1767_s20  ;;  %911 = vrot.lane.b32.xlu1 %v904_v48, %s1767_s20  ;;  %s387_s20 = scalar_lea.vmem [#allocation13], %s1329_s8  ;;  %s1781_s8 = smov [#allocation13]  }
 0x3ad   : > { %s1184_s2 = sshll.u32 %s387_s20, 4  ;;  %s1665_s30 = sshll.u32 %s1781_s8, 4  ;;  %s1185_s2 = int_to_ptr.vmem [resolvable:$true] %s1184_s2  ;;  %s1666_s30 = int_to_ptr.vmem [resolvable:$false] %s1665_s30 }
 0x3ae   : > { %s1661_s28 = scalar_lea.vmem %s1185_s2, 256  ;;  %s1667_s11 = scalar_lea.vmem %s1666_s30, 512 }
 0x3af   : > { %p1662_p2 = scmp.ne.s32.totalorder %s1185_s2, %s1661_s28  ;;  %p1668_p1 = scmp.lt.s32.totalorder %s1185_s2, %s1666_s30 }
 0x3b0   : > { %941 = vrot.lane.b32.xlu0 %v934_v55, %s1772_s18  ;;  %943 = vrot.lane.b32.xlu1 %v935_v56, %s1772_s18  ;;  %s2198_s18 = scalar_lea.hbm %s2242_s7, %s1349_s12  ;;  %p1669_p4 = scmp.lt.s32.totalorder %s1667_s11, %s1661_s28 }
 0x3b1   : > { %v851_v62 = vpop.permute.xlu1 %850  ;;  %p1663_p11 = pnand %p1662_p2, %p2270_p9 }
 0x3b2   : > { %v853_v1 = vadd.f32 %v851_v62, %v847_v57  ;;  %v854_v2 = vadd.f32 %v851_v62, %v848_v58  ;;  %p1670_p6 = por %p1669_p4, %p1668_p1 }
 0x3b3   : > { %p1664_p12 = pneg %p1663_p11 }
 0x3b4   : > { %v2155_v8 = vadd.f32 %v858_v60, %v853_v1  ;;  %v2157_v9 = vadd.f32 %v859_v61, %v854_v2  ;;  %973 = vrot.lane.b32.xlu0 %v965_v3, %s1773_s17  ;;  %971 = vrot.lane.b32.xlu1 %v964_v6, %s1773_s17  ;;  %s1170_s17 = scalar_lea.sflag [#allocation4], %s2020_s3 }
 0x3b5   : > { %p1671_p10 = pnand %p1670_p6, %p1664_p12 }
 0x3b8   : > { %1001 = vrot.lane.b32.xlu0 %v994_v12, %s1778_s14  ;;  %1003 = vrot.lane.b32.xlu1 %v995_v13, %s1778_s14 }
 0x3bc   : > { %1033 = vrot.lane.b32.xlu0 %v1025_v20, %s1779_s15  ;;  %1031 = vrot.lane.b32.xlu1 %v1024_v19, %s1779_s15 }
 0x3c0   : > { %1063 = vrot.lane.b32.xlu1 %v1055_v26, %s1780_s10  ;;  %1061 = vrot.lane.b32.xlu0 %v1054_v25, %s1780_s10 }
 0x3c4   : > { %565 = vperm.xlu1 %1490, %v2054_v4   ;;  %1059 = vrot.lane.b32.xlu0 %v1053_v31, %s1780_s10 }
 0x3c8   : > { %1073 = vperm.xlu1 %1490, %v2078_v41   ;;  %1076 = vrot.lane.b32.xlu0 %v2078_v41, %s1770_s13 }
 0x40e   : > { %v880_v36 = vpop.permute.xlu0 %879  ;;  %v910_v28 = vpop.permute.xlu1 %909 }
 0x412   : > { %v940_v37 = vpop.permute.xlu0 %939  ;;  %v970_v38 = vpop.permute.xlu1 %969 }
 0x416   : > { %v1000_v39 = vpop.permute.xlu0 %999  ;;  %v1030_v40 = vpop.permute.xlu1 %1029 }
 0x41a   : > { %v882_v42 = vpop.permute.xlu0 %881  ;;  %v884_v4 = vpop.permute.xlu1 %883 }
 0x41b   : > { %v887_v47 = vsel %vm885_vm14, %v882_v42, %v884_v4  ;;  %v886_v51 = vsel %vm885_vm14, %v880_v36, %v882_v42 }
 0x41c   : > { %v891_v50 = vadd.f32 %v887_v47, %v2157_v9  ;;  %v890_v58 = vadd.f32 %v886_v51, %v2155_v8 }
 0x41e   : > { %v914_v43 = vpop.permute.xlu0 %913  ;;  %v912_v44 = vpop.permute.xlu1 %911 }
 0x41f   : > { %v917_v41 = vsel %vm915_vm15, %v912_v44, %v914_v43  ;;  %v916_v56 = vsel %vm915_vm15, %v910_v28, %v912_v44 }
 0x420   : > { %v921_v53 = vadd.f32 %v917_v41, %v891_v50  ;;  %v920_v62 = vadd.f32 %v916_v56, %v890_v58 }
 0x422   : > { %v942_v45 = vpop.permute.xlu0 %941  ;;  %v944_v46 = vpop.permute.xlu1 %943 }
 0x423   : > { %v947_v52 = vsel %vm945_vm0, %v942_v45, %v944_v46  ;;  %v946_v60 = vsel %vm945_vm0, %v940_v37, %v942_v45 }
 0x424   : > { %v951_v59 = vadd.f32 %v947_v52, %v921_v53  ;;  %v950_v7 = vadd.f32 %v946_v60, %v920_v62 }
 0x426   : > { %v974_v48 = vpop.permute.xlu0 %973  ;;  %v972_v49 = vpop.permute.xlu1 %971 }
 0x427   : > { %v977_v57 = vsel %vm975_vm1, %v972_v49, %v974_v48  ;;  %v976_v3 = vsel %vm975_vm1, %v970_v38, %v972_v49 }
 0x428   : > { %v981_v63 = vadd.f32 %v977_v57, %v951_v59  ;;  %v980_v8 = vadd.f32 %v976_v3, %v950_v7 }
 0x42a   : > { %v1002_v54 = vpop.permute.xlu0 %1001  ;;  %v1004_v55 = vpop.permute.xlu1 %1003 }
 0x42b   : > { %v1007_v61 = vsel %vm1005_vm2, %v1002_v54, %v1004_v55  ;;  %v1006_v0 = vsel %vm1005_vm2, %v1000_v39, %v1002_v54 }
 0x42c   : > { %v1011_v9 = vadd.f32 %v1007_v61, %v981_v63  ;;  %v1010_v15 = vadd.f32 %v1006_v0, %v980_v8 }
 0x42e   : > { %v1034_v1 = vpop.permute.xlu0 %1033  ;;  %v1032_v2 = vpop.permute.xlu1 %1031 }
 0x42f   : > { %v1037_v6 = vsel %vm1035_vm3, %v1032_v2, %v1034_v1  ;;  %v1036_v13 = vsel %vm1035_vm3, %v1030_v40, %v1032_v2 }
 0x430   : > { %v1041_v10 = vadd.f32 %v1037_v6, %v1011_v9  ;;  %v1040_v17 = vadd.f32 %v1036_v13, %v1010_v15 }
 0x432   : > { %v1062_v11 = vpop.permute.xlu0 %1061  ;;  %v1064_v12 = vpop.permute.xlu1 %1063 }
 0x433   : > { %v1067_v14 = vsel %vm1065_vm6, %v1062_v11, %v1064_v12 }
 0x434   : > { %v1071_v16 = vadd.f32 %v1067_v14, %v1041_v10 }
 0x436   : > { %v1060_v18 = vpop.permute.xlu0 %1059  ;;  %1340 = vmatprep.subr.msk.mxu1 %vm573_vm4, %v1071_v16 }
 0x437   : > { %v1066_v19 = vsel %vm1065_vm6, %v1060_v18, %v1062_v11 }
 0x438   : > { %v1070_v20 = vadd.f32 %v1066_v19, %v1040_v17 }
 0x43a   : > { %v1077_v21 = vpop.permute.xlu0 %1076  ;;  %1341 = vmatpush1.msk.msra.mxu1 %vm573_vm4, %v1070_v20 }
 0x43b   : > { %1342 = vmatmul.mubr.msk.f32.vlgmr.msra.gmra.mxu1 %vm570_vm5, %v1077_v21 }
 0x43f   : > { %v566_v22 = vpop.permute.xlu1 %565 }
 0x440   : > { %v644_v23 = vadd.f32 %v2097_v5, %v566_v22 }
 0x442   : > { %v647_v24 = vmax.f32 %v644_v23, 0.0 }
 0x443   : > { %v1074_v25 = vpop.permute.xlu1 %1073 }
 0x444   : > { %1338 = vmatmul.mubr.msk.f32.vlgmr.msra.gmra.mxu0 %vm664_vm7, %v647_v24 }
 0x4fb   : > { %v1152_v26 = vpop.f32.mrf.mxu1 }
 0x4fc   : > { %v1153_v27 = vadd.f32 %v1152_v26, %v1074_v25 }
 0x4fd   : > { %v1154_v29 = vpop.f32.mrf.mxu1 }
 0x4fe   : > { %v1157_v30 = vmax.f32 %v1153_v27, 0.0  ;;  %v1155_v31 = vadd.f32 %v1154_v29, %v1074_v25 }
 0x500   : > { %v1163_v32 = vrot.slane %v1157_v30, 4  ;;  %v1158_v33 = vmax.f32 %v1155_v31, 0.0 }
 0x502   : > { %1167 = vst [vmem:[%s387_s20] sm:$0xf0] %v1163_v32  ;;  %v1164_v34 = vrot.slane %v1158_v33, 4 }
 0x504   : > { %1168 = vst [vmem:[%s387_s20 + $0x8] sm:$0xf0] %v1164_v34  ;;  %v734_v5 = vpop.f32.mrf.mxu0 }
 0x505   : > { %1159 = vst [vmem:[%s387_s20] sm:$0xf] %v734_v5 }
 0x506   : > { %v736_v35 = vpop.f32.mrf.mxu0 }
 0x507   : > { %1160 = vst [vmem:[%s387_s20 + $0x8] sm:$0xf] %v736_v35 }
 0x508   : > { %1674 = shalt.err (!%p1671_p10)
}
 0x509   : > { %s1675_s16 = scalar_lea.hbm %s2198_s18, 256  ;;  %s1679_s21 = scalar_lea.hbm %s2242_s7, 512 }
 0x50a   : > { %p1676_p3 = scmp.ne.s32.totalorder %s2198_s18, %s1675_s16  ;;  %p1680_p8 = scmp.lt.s32.totalorder %s2198_s18, %s2242_s7 }
 0x50b   : > { %p1681_p13 = scmp.lt.s32.totalorder %s1679_s21, %s1675_s16 }
 0x50c   : > { %p1677_p7 = pnand %p1676_p3, %p2270_p9 }
 0x50d   : > { %p1682_p0 = por %p1681_p13, %p1680_p8 }
 0x50e   : > { %p1678_p5 = pneg %p1677_p7 }
 0x510   : > { %p1683_p2 = pnand %p1682_p0, %p1678_p5 }
 0x512   : > { %1686 = shalt.err (!%p1683_p2)
}
 0x513   : > { %1384 = dma.vmem_to_hbm [thread:$0]  (%p2270_p9), %s1185_s2, 256, %s2198_s18, %s1170_s17  }
 0x514 PF: > { %s1196_s10 = sand.u32 1, %s1729_s24   ;;  %p2271_p11 = scmp.ne.s32.totalorder %s2257_s9, 0 }
 0x515   : > { %p2272_p12 = scmp.ge.s32.totalorder %s1741_s27, 2  ;;  %s1197_s20 = scalar_lea.sflag [#allocation4], %s1196_s10 }
 0x517   : > { %p1407_p1 = pnand %p2272_p12, %p2271_p11 }
 0x519   : > { %p1408_p4 = pneg %p1407_p1 }
 0x51b   : > { %1724 = dma.done.wait (%p1408_p4), %s1197_s20, 256  }
 0x51c   : > { %1726 = vsyncadd (%p1408_p4), %s1197_s20, 4294967040  ;;  %p25_p6 = scmp.ge.s32.totalorder %s1911_s19, 4   ;;  %s2273_s24 = smov %s1733_s25 }
 0x51d   : > { %s2274_s25 = smov %s1737_s26  ;;  %s2275_s26 = smov %s1922_s22 }
 0x51e   : > { %s2276_s27 = smov %s1911_s19  ;;  %27 = sbr.rel (!%p25_p6) target bundleno = 13 (0xd), region = 122 }
 0x523   :  { %1202 = vsyncpa [#allocation3], 1 }
 0x524   :  { %1204 = vsyncpa [#allocation3 + $0x1], 1 }
 0x525   :  { %1205 = vsyncpa [#allocation6], 1 }
 0x526   :  { %1207 = vsyncpa [#allocation6 + $0x1], 1 }
 0x527   :  { %1208 = vsyncpa [#allocation9], 1 }
 0x528   :  { %1209 = vsyncpa [#allocation12], 1 }
 0x529   :  { %1210 = vsyncpa [#allocation4], 1 }
 0x52a   :  { %1212 = vsyncpa [#allocation4 + $0x1], 1 }

</bundles_post_ra>
